<compile_context>
chip_gen: v6e
topology: v6e:2x2x1
jax: 0.10.0
libtpu: 0.0.40
codegen_flags: <defaults>
</compile_context>

<pallas_src>
import functools
import math

import jax
import jax.numpy as jnp
from jax import lax
from jax.experimental import pallas as pl
from jax.experimental.pallas import tpu as pltpu

TWO_PI = 2.0 * math.pi
PI = math.pi

_MAX_BM = 8192     # keeps double-buffered tiles well under v5e's 16 MiB default
_LANE_MULT = 256   # full 256-lane MXU passes on v6e / v7x


def _round_up(x, m):
    return ((x + m - 1) // m) * m


def _softplus(x):
    # Branch-free numerically stable softplus (== torch.nn.Softplus in f32).
    return jnp.maximum(x, 0.0) + jnp.log1p(jnp.exp(-jnp.abs(x)))


def _sigmoid(x):
    # Stable in f32: exp(-x) overflow -> inf -> result 0, which is correct.
    return 1.0 / (1.0 + jnp.exp(-x))


def decoder_kernel(z_ref, w1_ref, b1_ref, w2_ref, b2_ref, w3_ref, b3_ref,
                   out_ref, *, positive_constant):
    # z tile arrives in natural (bm, in_dim) layout; contract the feature
    # axis of both operands so activations live as (features, bm) -> the
    # batch (multiple of 256) sits on the lane axis for compute and stores.
    z = z_ref[...]                                                    # (bm, in_dim)

    h = lax.dot_general(w1_ref[...], z,                               # (hidden, bm)
                        (((1,), (1,)), ((), ())),
                        preferred_element_type=jnp.float32)
    h = _softplus(h + b1_ref[...])

    h = jnp.dot(w2_ref[...], h, preferred_element_type=jnp.float32)  # (hidden, bm)
    h = _softplus(h + b2_ref[...])

    # Fused output heads: rows 0:2 = fc31 (loc), rows 2:4 = fc32 (k).
    o = jnp.dot(w3_ref[...], h, preferred_element_type=jnp.float32)  # (4, bm)
    o = o + b3_ref[...]

    loc_branch = _sigmoid(o) * TWO_PI - PI
    k_branch = positive_constant + jnp.maximum(o, 0.0)

    row = lax.broadcasted_iota(jnp.int32, o.shape, 0)
    out = jnp.where(row < 2, loc_branch, k_branch)                    # (4, bm)
    out_ref[...] = out.astype(out_ref.dtype)


def _choose_tiling(B):
    """Pick (bm, Bp, n_steps): bm multiple of 256, <= _MAX_BM, minimal padding."""
    b_aligned = _round_up(B, _LANE_MULT)
    n_steps = -(-b_aligned // _MAX_BM)                  # ceil-div
    bm = _round_up(-(-b_aligned // n_steps), _LANE_MULT)
    return bm, bm * n_steps, n_steps


def decoder_forward(z, params, positive_constant, *, bm=None):
    """Run the decoder MLP as a single Pallas kernel, tiled over the batch.

    z: (B, z_dim + amino_acid_labels), natural layout.  Weights are kept in
    the native torch layout (out_features, in_features); biases (out, 1).
    Returns (loc_img, k), each (B, 2).
    """
    w1, b1, w2, b2, w3, b3 = params
    B, in_dim = z.shape
    hidden_dim = w1.shape[0]
    out_rows = w3.shape[0]  # 4 = 2 (loc) + 2 (k)

    if bm is None:
        bm, Bp, n_steps = _choose_tiling(B)
    else:
        Bp = _round_up(B, bm)
        n_steps = Bp // bm

    # Only pad when the batch is not tile-aligned (zero rows are computed,
    # then sliced away; all ops are finite on zeros).
    z_in = z if Bp == B else jnp.pad(z, ((0, Bp - B), (0, 0)))

    def rep(shape):
        # Grid-invariant (resident) weight/bias blocks.
        return pl.BlockSpec(shape, lambda i: (0, 0))

    cost = pl.CostEstimate(
        flops=2 * Bp * (in_dim * hidden_dim + hidden_dim * hidden_dim
                        + hidden_dim * out_rows),
        transcendentals=Bp * (4 * hidden_dim + out_rows),
        bytes_accessed=4 * (Bp * in_dim + Bp * out_rows + w1.size + b1.size
                            + w2.size + b2.size + w3.size + b3.size),
    )

    kern = functools.partial(decoder_kernel,
                             positive_constant=float(positive_constant))

    out_t = pl.pallas_call(
        kern,
        out_shape=jax.ShapeDtypeStruct((out_rows, Bp), z.dtype),
        grid_spec=pltpu.PrefetchScalarGridSpec(
            num_scalar_prefetch=0,
            grid=(n_steps,),
            in_specs=[
                pl.BlockSpec((bm, in_dim), lambda i: (i, 0)),   # natural z tile
                rep(w1.shape), rep(b1.shape),
                rep(w2.shape), rep(b2.shape),
                rep(w3.shape), rep(b3.shape),
            ],
            out_specs=pl.BlockSpec((out_rows, bm), lambda i: (0, i)),
        ),
        compiler_params=pltpu.CompilerParams(
            dimension_semantics=("parallel",)),
        cost_estimate=cost,
    )(z_in, w1, b1, w2, b2, w3, b3)

    loc_img = out_t[0:2, :B].T
    k = out_t[2:4, :B].T
    return loc_img, k


def init_params(key, in_dim, hidden_dim, dtype=jnp.float32):
    """Deterministic init mimicking nn.Linear's uniform(-1/sqrt(fan_in), ...).
    Weights kept in torch layout (out_features, in_features); biases (out, 1).
    The two output heads (fc31, fc32) are fused into one (4, hidden) weight."""
    keys = jax.random.split(key, 8)

    def linear(kw, kb, fan_in, fan_out):
        bound = 1.0 / math.sqrt(fan_in)
        w = jax.random.uniform(kw, (fan_out, fan_in), dtype, -bound, bound)
        b = jax.random.uniform(kb, (fan_out, 1), dtype, -bound, bound)
        return w, b

    w1, b1 = linear(keys[0], keys[1], in_dim, hidden_dim)
    w2, b2 = linear(keys[2], keys[3], hidden_dim, hidden_dim)
    w31, b31 = linear(keys[4], keys[5], hidden_dim, 2)
    w32, b32 = linear(keys[6], keys[7], hidden_dim, 2)
    w3 = jnp.concatenate([w31, w32], axis=0)   # (4, hidden)
    b3 = jnp.concatenate([b31, b32], axis=0)   # (4, 1)
    return (w1, b1, w2, b2, w3, b3)


def decoder_ref(z, params, positive_constant):
    """Pure-JAX reference matching the PyTorch forward exactly."""
    w1, b1, w2, b2, w3, b3 = params
    h = jax.nn.softplus(z @ w1.T + b1[:, 0])
    h = jax.nn.softplus(h @ w2.T + b2[:, 0])
    o = h @ w3.T + b3[:, 0]
    loc_img = jax.nn.sigmoid(o[:, 0:2]) * TWO_PI - PI
    k = positive_constant + jax.nn.relu(o[:, 2:4])
    return loc_img, k


if __name__ == "__main__":
    # Shapes consistent with the module: z = concat(latent, amino-acid one-hot).
    amino_acid_labels = 20
    z_dim = 8
    hidden_dim = 32
    positive_constant = 0.1
    in_dim = z_dim + amino_acid_labels   # 28
    batch = 256                          # auto-tiling -> single 256-wide step

    key = jax.random.PRNGKey(0)
    kz, kp = jax.random.split(key)
    z = jax.random.normal(kz, (batch, in_dim), jnp.float32)
    params = init_params(kp, in_dim, hidden_dim)

    loc_img, k = decoder_forward(z, params, positive_constant)
    jax.block_until_ready((loc_img, k))

    # Sanity check against the pure-JAX reference.
    loc_ref, k_ref = decoder_ref(z, params, positive_constant)
    assert loc_img.shape == (batch, 2) and k.shape == (batch, 2)
    assert jnp.allclose(loc_img, loc_ref, atol=1e-5, rtol=1e-5)
    assert jnp.allclose(k, k_ref, atol=1e-5, rtol=1e-5)

    # Also exercise a non-aligned batch (remainder padding path).
    z2 = jax.random.normal(kz, (37, in_dim), jnp.float32)
    loc2, k2 = decoder_forward(z2, params, positive_constant)
    loc2_ref, k2_ref = decoder_ref(z2, params, positive_constant)
    assert jnp.allclose(loc2, loc2_ref, atol=1e-5, rtol=1e-5)
    assert jnp.allclose(k2, k2_ref, atol=1e-5, rtol=1e-5)

    print("KERNEL_OK")
</pallas_src>

<mosaic_0001>
module attributes {stable_mosaic.version = 11 : i64} {
  func.func @decoder_kernel(%arg0: i32, %arg1: memref<256x28xf32, #tpu.memory_space<vmem>>, %arg2: memref<32x28xf32, #tpu.memory_space<vmem>>, %arg3: memref<32x1xf32, #tpu.memory_space<vmem>>, %arg4: memref<32x32xf32, #tpu.memory_space<vmem>>, %arg5: memref<32x1xf32, #tpu.memory_space<vmem>>, %arg6: memref<4x32xf32, #tpu.memory_space<vmem>>, %arg7: memref<4x1xf32, #tpu.memory_space<vmem>>, %arg8: memref<4x256xf32, #tpu.memory_space<vmem>>) attributes {dimension_semantics = [#tpu.dimension_semantics<parallel>], iteration_bounds = array<i64: 1>, scalar_prefetch = 0 : i64, scratch_operands = 0 : i64, tpu.core_type = #tpu.core_type<tc>, window_params = [{transform_indices = @transform_0, window_bounds = array<i64: 256, 28>}, {pipeline_mode = #tpu.pipeline_mode<synchronous>, transform_indices = @transform_1, window_bounds = array<i64: 32, 28>}, {pipeline_mode = #tpu.pipeline_mode<synchronous>, transform_indices = @transform_2, window_bounds = array<i64: 32, 1>}, {pipeline_mode = #tpu.pipeline_mode<synchronous>, transform_indices = @transform_3, window_bounds = array<i64: 32, 32>}, {pipeline_mode = #tpu.pipeline_mode<synchronous>, transform_indices = @transform_4, window_bounds = array<i64: 32, 1>}, {pipeline_mode = #tpu.pipeline_mode<synchronous>, transform_indices = @transform_5, window_bounds = array<i64: 4, 32>}, {pipeline_mode = #tpu.pipeline_mode<synchronous>, transform_indices = @transform_6, window_bounds = array<i64: 4, 1>}, {transform_indices = @transform_7, window_bounds = array<i64: 4, 256>}]} {
    %c0 = arith.constant 0 : index
    %c0_0 = arith.constant 0 : index
    %0 = vector.load %arg1[%c0, %c0_0] : memref<256x28xf32, #tpu.memory_space<vmem>>, vector<256x28xf32>
    %c0_1 = arith.constant 0 : index
    %c0_2 = arith.constant 0 : index
    %1 = vector.load %arg2[%c0_1, %c0_2] : memref<32x28xf32, #tpu.memory_space<vmem>>, vector<32x28xf32>
    %cst = arith.constant dense<0.000000e+00> : vector<32x256xf32>
    %2 = tpu.matmul %1, %0, %cst {dimension_numbers = #tpu.dot_dimension_numbers<[1], [1], [0], [0], [0, 0, 1, 0], [], []>} : vector<32x28xf32>, vector<256x28xf32>, vector<32x256xf32> -> vector<32x256xf32>
    %c0_3 = arith.constant 0 : index
    %c0_4 = arith.constant 0 : index
    %3 = vector.load %arg3[%c0_3, %c0_4] : memref<32x1xf32, #tpu.memory_space<vmem>>, vector<32x1xf32>
    %4 = vector.broadcast %3 : vector<32x1xf32> to vector<32x256xf32>
    %5 = arith.addf %2, %4 : vector<32x256xf32>
    %cst_5 = arith.constant 0.000000e+00 : f32
    %6 = vector.broadcast %cst_5 : f32 to vector<32x256xf32>
    %7 = arith.maximumf %5, %6 : vector<32x256xf32>
    %8 = math.absf %5 : vector<32x256xf32>
    %cst_6 = arith.constant 0.000000e+00 : f32
    %9 = vector.broadcast %cst_6 : f32 to vector<32x256xf32>
    %10 = arith.subf %9, %8 : vector<32x256xf32>
    %11 = math.exp %10 : vector<32x256xf32>
    %12 = math.log1p %11 : vector<32x256xf32>
    %13 = arith.addf %7, %12 : vector<32x256xf32>
    %c0_7 = arith.constant 0 : index
    %c0_8 = arith.constant 0 : index
    %14 = vector.load %arg4[%c0_7, %c0_8] : memref<32x32xf32, #tpu.memory_space<vmem>>, vector<32x32xf32>
    %cst_9 = arith.constant dense<0.000000e+00> : vector<32x256xf32>
    %15 = tpu.matmul %14, %13, %cst_9 {dimension_numbers = #tpu.dot_dimension_numbers<[1], [0], [0], [1], [0, 0, 1, 1], [], []>} : vector<32x32xf32>, vector<32x256xf32>, vector<32x256xf32> -> vector<32x256xf32>
    %c0_10 = arith.constant 0 : index
    %c0_11 = arith.constant 0 : index
    %16 = vector.load %arg5[%c0_10, %c0_11] : memref<32x1xf32, #tpu.memory_space<vmem>>, vector<32x1xf32>
    %17 = vector.broadcast %16 : vector<32x1xf32> to vector<32x256xf32>
    %18 = arith.addf %15, %17 : vector<32x256xf32>
    %cst_12 = arith.constant 0.000000e+00 : f32
    %19 = vector.broadcast %cst_12 : f32 to vector<32x256xf32>
    %20 = arith.maximumf %18, %19 : vector<32x256xf32>
    %21 = math.absf %18 : vector<32x256xf32>
    %cst_13 = arith.constant 0.000000e+00 : f32
    %22 = vector.broadcast %cst_13 : f32 to vector<32x256xf32>
    %23 = arith.subf %22, %21 : vector<32x256xf32>
    %24 = math.exp %23 : vector<32x256xf32>
    %25 = math.log1p %24 : vector<32x256xf32>
    %26 = arith.addf %20, %25 : vector<32x256xf32>
    %c0_14 = arith.constant 0 : index
    %c0_15 = arith.constant 0 : index
    %27 = vector.load %arg6[%c0_14, %c0_15] : memref<4x32xf32, #tpu.memory_space<vmem>>, vector<4x32xf32>
    %cst_16 = arith.constant dense<0.000000e+00> : vector<4x256xf32>
    %28 = tpu.matmul %27, %26, %cst_16 {dimension_numbers = #tpu.dot_dimension_numbers<[1], [0], [0], [1], [0, 0, 1, 1], [], []>} : vector<4x32xf32>, vector<32x256xf32>, vector<4x256xf32> -> vector<4x256xf32>
    %c0_17 = arith.constant 0 : index
    %c0_18 = arith.constant 0 : index
    %29 = vector.load %arg7[%c0_17, %c0_18] : memref<4x1xf32, #tpu.memory_space<vmem>>, vector<4x1xf32>
    %30 = vector.broadcast %29 : vector<4x1xf32> to vector<4x256xf32>
    %31 = arith.addf %28, %30 : vector<4x256xf32>
    %cst_19 = arith.constant 0.000000e+00 : f32
    %32 = vector.broadcast %cst_19 : f32 to vector<4x256xf32>
    %33 = arith.subf %32, %31 : vector<4x256xf32>
    %34 = math.exp %33 : vector<4x256xf32>
    %cst_20 = arith.constant 1.000000e+00 : f32
    %35 = vector.broadcast %cst_20 : f32 to vector<4x256xf32>
    %36 = arith.addf %35, %34 : vector<4x256xf32>
    %cst_21 = arith.constant 1.000000e+00 : f32
    %37 = vector.broadcast %cst_21 : f32 to vector<4x256xf32>
    %38 = arith.divf %37, %36 : vector<4x256xf32>
    %cst_22 = arith.constant 6.28318548 : f32
    %39 = vector.broadcast %cst_22 : f32 to vector<4x256xf32>
    %40 = arith.mulf %38, %39 : vector<4x256xf32>
    %cst_23 = arith.constant 3.14159274 : f32
    %41 = vector.broadcast %cst_23 : f32 to vector<4x256xf32>
    %42 = arith.subf %40, %41 : vector<4x256xf32>
    %cst_24 = arith.constant 0.000000e+00 : f32
    %43 = vector.broadcast %cst_24 : f32 to vector<4x256xf32>
    %44 = arith.maximumf %31, %43 : vector<4x256xf32>
    %cst_25 = arith.constant 1.000000e-01 : f32
    %45 = vector.broadcast %cst_25 : f32 to vector<4x256xf32>
    %46 = arith.addf %45, %44 : vector<4x256xf32>
    %47 = tpu.iota {dimensions = array<i32: 0>} : vector<4x256xi32>
    %c2_i32 = arith.constant 2 : i32
    %48 = vector.broadcast %c2_i32 : i32 to vector<4x256xi32>
    %49 = arith.cmpi slt, %47, %48 : vector<4x256xi32>
    %50 = arith.select %49, %42, %46 : vector<4x256xi1>, vector<4x256xf32>
    %c0_26 = arith.constant 0 : index
    %c0_27 = arith.constant 0 : index
    %51 = vector.load %arg8[%c0_26, %c0_27] : memref<4x256xf32, #tpu.memory_space<vmem>>, vector<4x256xf32>
    tpu.vector_store %arg8[%c0_26, %c0_27], %50 {strides = array<i32>} : memref<4x256xf32, #tpu.memory_space<vmem>>, vector<4x256xf32>,
    return
  }
  func.func @transform_0(%arg0: i32) -> (i32, i32) {
    %c0_i32 = arith.constant 0 : i32
    %c0_i32_0 = arith.constant 0 : i32
    return %arg0, %c0_i32 : i32, i32
  }
  func.func @transform_1(%arg0: i32) -> (i32, i32) {
    %c0_i32 = arith.constant 0 : i32
    %c0_i32_0 = arith.constant 0 : i32
    %c0_i32_1 = arith.constant 0 : i32
    return %c0_i32, %c0_i32_0 : i32, i32
  }
  func.func @transform_2(%arg0: i32) -> (i32, i32) {
    %c0_i32 = arith.constant 0 : i32
    %c0_i32_0 = arith.constant 0 : i32
    %c0_i32_1 = arith.constant 0 : i32
    return %c0_i32, %c0_i32_0 : i32, i32
  }
  func.func @transform_3(%arg0: i32) -> (i32, i32) {
    %c0_i32 = arith.constant 0 : i32
    %c0_i32_0 = arith.constant 0 : i32
    %c0_i32_1 = arith.constant 0 : i32
    return %c0_i32, %c0_i32_0 : i32, i32
  }
  func.func @transform_4(%arg0: i32) -> (i32, i32) {
    %c0_i32 = arith.constant 0 : i32
    %c0_i32_0 = arith.constant 0 : i32
    %c0_i32_1 = arith.constant 0 : i32
    return %c0_i32, %c0_i32_0 : i32, i32
  }
  func.func @transform_5(%arg0: i32) -> (i32, i32) {
    %c0_i32 = arith.constant 0 : i32
    %c0_i32_0 = arith.constant 0 : i32
    %c0_i32_1 = arith.constant 0 : i32
    return %c0_i32, %c0_i32_0 : i32, i32
  }
  func.func @transform_6(%arg0: i32) -> (i32, i32) {
    %c0_i32 = arith.constant 0 : i32
    %c0_i32_0 = arith.constant 0 : i32
    %c0_i32_1 = arith.constant 0 : i32
    return %c0_i32, %c0_i32_0 : i32, i32
  }
  func.func @transform_7(%arg0: i32) -> (i32, i32) {
    %c0_i32 = arith.constant 0 : i32
    %c0_i32_0 = arith.constant 0 : i32
    return %c0_i32, %arg0 : i32, i32
  }
}

</mosaic_0001>

<bundles_post_ra>
// kernel: tpu_custom_call.1
= control target key start
LH: loop header
LB: loop body
LE: loop exit
PB: predicated region body
PF: predicated region fallthrough
CT: control target
= control target key end

     0   :  { %vm87_vm0 = vcmask 228352   ;;  %v962_v3 = vmov 0   ;;  %s1404_s0 = inlined_call_operand.vmem [shape: f32[256,28], index: 0, kind: input, shape index: {}]   ;;  %s1405_s1 = inlined_call_operand.vmem [shape: f32[32,28], index: 1, kind: input, shape index: {}]   ;;  %s1406_s2 = inlined_call_operand.vmem [shape: f32[32,1], index: 2, kind: input, shape index: {}]   ;;  %s1407_s3 = inlined_call_operand.vmem [shape: f32[32,32], index: 3, kind: input, shape index: {}]   ;;  %s1408_s4 = inlined_call_operand.vmem [shape: f32[32,1], index: 4, kind: input, shape index: {}]   ;;  %s1409_s5 = inlined_call_operand.vmem [shape: f32[4,32], index: 5, kind: input, shape index: {}]   ;;  %s1410_s6 = inlined_call_operand.vmem [shape: f32[4,1], index: 6, kind: input, shape index: {}]   ;;  %s1411_s7 = inlined_call_operand.hbm [shape: f32[4,256], index: 7, kind: output, shape index: {}]  }
   0x1   :  { %v58_v0 = vld [vmem:[%s1404_s0 + $0xf8] sm:$0xff]  ;;  %v57_v2 = vld [vmem:[%s1404_s0 + $0xf0] sm:$0xff]  ;;  %867 = vset.pattern.permute.xlu1 %v962_v3  ;;  %866 = vset.pattern.permute.xlu0 %v962_v3  ;;  %v56_v5 = vld [vmem:[%s1404_s0 + $0xe8] sm:$0xff] }
   0x2   :  { %v42_v1 = vld [vmem:[%s1404_s0 + $0x78] sm:$0xff]  ;;  %823 = vmatprep.subr.msk.mxu0 %vm87_vm0, %v58_v0  ;;  %v41_v4 = vld [vmem:[%s1404_s0 + $0x70] sm:$0xff]  ;;  %v40_v6 = vld [vmem:[%s1404_s0 + $0x68] sm:$0xff] }
   0x3   :  { %824 = vmatpush3.xpose.msk.msra.mxu0 %vm87_vm0, %v42_v1  ;;  %v55_v7 = vld [vmem:[%s1404_s0 + $0xe0] sm:$0xff]  ;;  %v54_v10 = vld [vmem:[%s1404_s0 + $0xd8] sm:$0xff]  ;;  %v64_v12 = vld [vmem:[%s1406_s2 + $0x8] sm:$0xff] }
   0x4   :  { %825 = vmatprep.subr.msk.mxu0 %vm87_vm0, %v57_v2  ;;  %v1035_v8 = vld [vmem:[%s1405_s1] sm:$0xff]  ;;  %v66_v11 = vld [vmem:[%s1406_s2 + $0x18] sm:$0xff]  ;;  %74 = vperm.xlu1 %867, %v64_v12   ;;  %v65_v13 = vld [vmem:[%s1406_s2 + $0x10] sm:$0xff] }
   0x5   :  { %v39_v9 = vld [vmem:[%s1404_s0 + $0x60] sm:$0xff]  ;;  %855 = vmatprep.mubr.msk.f32.mxu0 %vm87_vm0, %v1035_v8  ;;  %84 = vperm.xlu0 %866, %v66_v11   ;;  %v38_v15 = vld [vmem:[%s1404_s0 + $0x58] sm:$0xff] }
   0x6   :  { %v63_v14 = vld [vmem:[%s1406_s2] sm:$0xff] }
   0x7   :  { %826 = vmatpush3.xpose.msk.msra.mxu0 %vm87_vm0, %v41_v4 }
   0x8   :  { %827 = vmatprep.subr.msk.mxu0 %vm87_vm0, %v56_v5 }
   0xb   :  { %828 = vmatpush3.xpose.msk.msra.mxu0 %vm87_vm0, %v40_v6 }
   0xc   :  { %829 = vmatprep.subr.msk.mxu0 %vm87_vm0, %v55_v7 }
   0xf   :  { %830 = vmatpush3.xpose.msk.msra.mxu0 %vm87_vm0, %v39_v9 }
  0x10   :  { %831 = vmatprep.subr.msk.mxu0 %vm87_vm0, %v54_v10 }
  0x11   :  { %12 = vsyncpa [#allocation3], 0  ;;  %v53_v16 = vld [vmem:[%s1404_s0 + $0xd0] sm:$0xff]  ;;  %79 = vperm.xlu0 %866, %v65_v13   ;;  %69 = vperm.xlu1 %867, %v63_v14   ;;  %v412_v17 = vld [vmem:[%s1408_s4 + $0x18] sm:$0xff]  ;;  %v963_v46 = vmov 0.0   ;;  %vm433_vm9 = vcmask 261120  }
  0x12   :  { %v411_v18 = vld [vmem:[%s1408_s4 + $0x10] sm:$0xff]  ;;  %v52_v20 = vld [vmem:[%s1404_s0 + $0xc8] sm:$0xff]  ;;  %v409_v22 = vld [vmem:[%s1408_s4] sm:$0xff]  ;;  %510 = vmatprep.mubr.f32.mxu1 %v963_v46 }
  0x13   :  { %832 = vmatpush3.xpose.msk.msra.mxu0 %vm87_vm0, %v38_v15  ;;  %v37_v19 = vld [vmem:[%s1404_s0 + $0x50] sm:$0xff]  ;;  %v410_v21 = vld [vmem:[%s1408_s4 + $0x8] sm:$0xff]  ;;  %v51_v24 = vld [vmem:[%s1404_s0 + $0xc0] sm:$0xff] }
  0x14   :  { %833 = vmatprep.subr.msk.mxu0 %vm87_vm0, %v53_v16  ;;  %v36_v23 = vld [vmem:[%s1404_s0 + $0x48] sm:$0xff]  ;;  %v656_v25 = vld [vmem:[%s1410_s6] sm:$0xf]  ;;  %v50_v27 = vld [vmem:[%s1404_s0 + $0xb8] sm:$0xff] }
  0x15   :  { %430 = vperm.xlu0 %866, %v412_v17   ;;  %425 = vperm.xlu1 %867, %v411_v18   ;;  %v35_v26 = vld [vmem:[%s1404_s0 + $0x40] sm:$0xff]  ;;  %v34_v28 = vld [vmem:[%s1404_s0 + $0x38] sm:$0xff]  ;;  %v49_v29 = vld [vmem:[%s1404_s0 + $0xb0] sm:$0xff] }
  0x16   :  { %v33_v30 = vld [vmem:[%s1404_s0 + $0x30] sm:$0xff]  ;;  %v48_v31 = vld [vmem:[%s1404_s0 + $0xa8] sm:$0xff]  ;;  %v47_v33 = vld [vmem:[%s1404_s0 + $0xa0] sm:$0xff] }
  0x17   :  { %834 = vmatpush3.xpose.msk.msra.mxu0 %vm87_vm0, %v37_v19  ;;  %v32_v32 = vld [vmem:[%s1404_s0 + $0x28] sm:$0xff]  ;;  %v31_v34 = vld [vmem:[%s1404_s0 + $0x20] sm:$0xff]  ;;  %v46_v35 = vld [vmem:[%s1404_s0 + $0x98] sm:$0xff] }
  0x18   :  { %835 = vmatprep.subr.msk.mxu0 %vm87_vm0, %v52_v20  ;;  %v30_v36 = vld [vmem:[%s1404_s0 + $0x18] sm:$0xff]  ;;  %v45_v37 = vld [vmem:[%s1404_s0 + $0x90] sm:$0xff]  ;;  %v44_v39 = vld [vmem:[%s1404_s0 + $0x88] sm:$0xff] }
  0x19   :  { %420 = vperm.xlu0 %866, %v410_v21   ;;  %415 = vperm.xlu1 %867, %v409_v22   ;;  %v29_v38 = vld [vmem:[%s1404_s0 + $0x10] sm:$0xff]  ;;  %v28_v40 = vld [vmem:[%s1404_s0 + $0x8] sm:$0xff]  ;;  %v43_v41 = vld [vmem:[%s1404_s0 + $0x80] sm:$0xff] }
  0x1a   :  { %v27_v42 = vld [vmem:[%s1404_s0] sm:$0xff]  ;;  %v60_v43 = vld [vmem:[%s1405_s1 + $0x8] sm:$0xff]  ;;  %v61_v44 = vld [vmem:[%s1405_s1 + $0x10] sm:$0xff] }
  0x1b   :  { %836 = vmatpush3.xpose.msk.msra.mxu0 %vm87_vm0, %v36_v23  ;;  %v62_v45 = vld [vmem:[%s1405_s1 + $0x18] sm:$0xff] }
  0x1c   :  { %837 = vmatprep.subr.msk.mxu0 %vm87_vm0, %v51_v24 }
  0x1d   :  { %659 = vperm.xlu0 %866, %v656_v25  }
  0x1f   :  { %838 = vmatpush3.xpose.msk.msra.mxu0 %vm87_vm0, %v35_v26 }
  0x20   :  { %839 = vmatprep.subr.msk.mxu0 %vm87_vm0, %v50_v27 }
  0x23   :  { %840 = vmatpush3.xpose.msk.msra.mxu0 %vm87_vm0, %v34_v28 }
  0x24   :  { %841 = vmatprep.subr.msk.mxu0 %vm87_vm0, %v49_v29 }
  0x27   :  { %842 = vmatpush3.xpose.msk.msra.mxu0 %vm87_vm0, %v33_v30 }
  0x28   :  { %843 = vmatprep.subr.msk.mxu0 %vm87_vm0, %v48_v31 }
  0x2b   :  { %844 = vmatpush3.xpose.msk.msra.mxu0 %vm87_vm0, %v32_v32 }
  0x2c   :  { %845 = vmatprep.subr.msk.mxu0 %vm87_vm0, %v47_v33 }
  0x2f   :  { %846 = vmatpush3.xpose.msk.msra.mxu0 %vm87_vm0, %v31_v34 }
  0x30   :  { %847 = vmatprep.subr.msk.mxu0 %vm87_vm0, %v46_v35 }
  0x33   :  { %848 = vmatpush3.xpose.msk.msra.mxu0 %vm87_vm0, %v30_v36 }
  0x34   :  { %849 = vmatprep.subr.msk.mxu0 %vm87_vm0, %v45_v37 }
  0x37   :  { %850 = vmatpush3.xpose.msk.msra.mxu0 %vm87_vm0, %v29_v38 }
  0x38   :  { %851 = vmatprep.subr.msk.mxu0 %vm87_vm0, %v44_v39 }
  0x3b   :  { %852 = vmatpush3.xpose.msk.msra.mxu0 %vm87_vm0, %v28_v40 }
  0x3c   :  { %853 = vmatprep.subr.msk.mxu0 %vm87_vm0, %v43_v41 }
  0x3f   :  { %854 = vmatpush3.xpose.msk.msra.mxu0 %vm87_vm0, %v27_v42 }
  0x42   :  { %856 = vmatmul.mubr.msk.f32.vlgmr.msra.gmra.mxu0 %vm87_vm0, %v1035_v8 }
  0x43   :  { %857 = vmatprep.mubr.msk.f32.mxu0 %vm87_vm0, %v60_v43 }
  0x46   :  { %858 = vmatmul.mubr.msk.f32.gmra.mxu0 %vm87_vm0, %v60_v43 }
  0x47   :  { %859 = vmatprep.mubr.msk.f32.mxu0 %vm87_vm0, %v61_v44 }
  0x4a   :  { %860 = vmatmul.mubr.msk.f32.gmra.mxu0 %vm87_vm0, %v61_v44 }
  0x4b   :  { %861 = vmatprep.mubr.msk.f32.mxu0 %vm87_vm0, %v62_v45 }
  0x4e   :  { %862 = vmatmul.mubr.msk.f32.gmra.mxu0 %vm87_vm0, %v62_v45 }
  0x7f   :  { %v75_v47 = vpop.permute.xlu1 %74 }
  0x80   :  { %v85_v50 = vpop.permute.xlu0 %84 }
  0x8c   :  { %v70_v48 = vpop.permute.xlu1 %69  ;;  %v80_v61 = vpop.permute.xlu0 %79 }
 0x102   :  { %v262_v49 = vpop.f32.mrf.mxu0 }
 0x103   :  { %v1185_v52 = vadd.f32 %v262_v49, %v70_v48 }
 0x104   :  { %v264_v51 = vpop.f32.mrf.mxu0 }
 0x105   :  { %v1187_v53 = vadd.f32 %v264_v51, %v70_v48  ;;  %v293_v58 = vand.u32 2147483647, %v1185_v52 }
 0x106   :  { %v268_v54 = vpop.f32.mrf.mxu0 }
 0x107   :  { %v294_v55 = vand.u32 2147483647, %v1187_v53  ;;  %v1190_v56 = vadd.f32 %v268_v54, %v75_v47  ;;  %v301_v5 = vsub.f32 0.0, %v293_v58 }
 0x108   :  { %v270_v57 = vpop.f32.mrf.mxu0 }
 0x109   :  { %v302_v59 = vsub.f32 0.0, %v294_v55  ;;  %v295_v60 = vand.u32 2147483647, %v1190_v56  ;;  %v1194_v62 = vadd.f32 %v270_v57, %v75_v47  ;;  %v309_v16 = vmul.f32 1.442695, %v301_v5 }
 0x10a   :  { %v274_v63 = vpop.f32.mrf.mxu0 }
 0x10b   :  { %v311_v0 = vmul.f32 1.442695, %v302_v59  ;;  %v1196_v1 = vadd.f32 %v274_v63, %v80_v61  ;;  %v303_v2 = vsub.f32 0.0, %v295_v60  ;;  %v296_v3 = vand.u32 2147483647, %v1194_v62 }
 0x10c   :  { %v276_v4 = vpop.f32.mrf.mxu0  ;;  %v288_v44 = vmax.f32 %v1194_v62, 0.0  ;;  %v408_v62 = vld [vmem:[%s1407_s3 + $0x18] sm:$0xff] }
 0x10d   :  { %v297_v6 = vand.u32 2147483647, %v1196_v1  ;;  %v304_v7 = vsub.f32 0.0, %v296_v3  ;;  %v1200_v8 = vadd.f32 %v276_v4, %v80_v61  ;;  %868 = vpow2.f32 %v311_v0 }
 0x10e   :  { %v280_v9 = vpop.f32.mrf.mxu0  ;;  %v313_v12 = vmul.f32 1.442695, %v303_v2  ;;  %v289_v49 = vmax.f32 %v1196_v1, 0.0  ;;  %v405_v1 = vld [vmem:[%s1407_s3] sm:$0xff] }
 0x10f   :  { %v305_v10 = vsub.f32 0.0, %v297_v6  ;;  %v1202_v11 = vadd.f32 %v280_v9, %v85_v50  ;;  %v315_v13 = vmul.f32 1.442695, %v304_v7  ;;  %v298_v14 = vand.u32 2147483647, %v1200_v8 }
 0x110   :  { %v282_v15 = vpop.f32.mrf.mxu0 }
 0x111   :  { %v317_v17 = vmul.f32 1.442695, %v305_v10  ;;  %v299_v18 = vand.u32 2147483647, %v1202_v11  ;;  %v1206_v19 = vadd.f32 %v282_v15, %v85_v50  ;;  %870 = vpow2.f32 %v315_v13 }
 0x112   :  { %v306_v20 = vsub.f32 0.0, %v298_v14  ;;  %v290_v50 = vmax.f32 %v1200_v8, 0.0  ;;  %v291_v57 = vmax.f32 %v1202_v11, 0.0 }
 0x113   :  { %872 = vpow2.f32 %v317_v17  ;;  %v307_v21 = vsub.f32 0.0, %v299_v18  ;;  %v300_v22 = vand.u32 2147483647, %v1206_v19  ;;  %v292_v63 = vmax.f32 %v1206_v19, 0.0 }
 0x114   :  { %874 = vpow2.f32 %v313_v12  ;;  %v319_v23 = vmul.f32 1.442695, %v306_v20 }
 0x115   :  { %876 = vpow2.f32 %v309_v16  ;;  %v321_v24 = vmul.f32 1.442695, %v307_v21  ;;  %v308_v25 = vsub.f32 0.0, %v300_v22 }
 0x116   :  { %878 = vpow2.f32 %v319_v23 }
 0x117   :  { %880 = vpow2.f32 %v321_v24  ;;  %v323_v26 = vmul.f32 1.442695, %v308_v25 }
 0x119   :  { %882 = vpow2.f32 %v323_v26 }
 0x11a   :  { %v1209_v27 = vpop.eup %868 }
 0x11b   :  { %v334_v29 = vadd.f32 1.0, %v1209_v27  ;;  %v337_v59 = vmul.f32 -0.5, %v1209_v27  ;;  %v340_v3 = vand.u32 2147483647, %v1209_v27 }
 0x11d   :  { %884 = vlog2.f32 %v334_v29  ;;  %v338_v18 = vadd.f32 1.0, %v337_v59  ;;  %vm341_vm7 = vcmp.lt.f32.partialorder %v340_v3, 0.0004427343 }
 0x11e   :  { %v1211_v28 = vpop.eup %870 }
 0x11f   :  { %v352_v31 = vadd.f32 1.0, %v1211_v28  ;;  %v355_v58 = vmul.f32 -0.5, %v1211_v28  ;;  %v358_v12 = vand.u32 2147483647, %v1211_v28 }
 0x120   :  { %v1214_v30 = vpop.eup %872 }
 0x121   :  { %v1217_v32 = vpop.eup %874  ;;  %v361_v33 = vadd.f32 1.0, %v1214_v30  ;;  %886 = vlog2.f32 %v352_v31  ;;  %v364_v47 = vmul.f32 -0.5, %v1214_v30  ;;  %v367_v0 = vand.u32 2147483647, %v1214_v30 }
 0x122   :  { %v1220_v34 = vpop.eup %876  ;;  %v343_v38 = vadd.f32 1.0, %v1217_v32  ;;  %v346_v43 = vmul.f32 -0.5, %v1217_v32  ;;  %v349_v13 = vand.u32 2147483647, %v1217_v32  ;;  %v356_v17 = vadd.f32 1.0, %v355_v58 }
 0x123   :  { %v1222_v35 = vpop.eup %878  ;;  %888 = vlog2.f32 %v361_v33  ;;  %v325_v41 = vadd.f32 1.0, %v1220_v34  ;;  %v328_v48 = vmul.f32 -0.5, %v1220_v34  ;;  %v331_v60 = vand.u32 2147483647, %v1220_v34 }
 0x124   :  { %v881_v36 = vpop.eup %880  ;;  %v370_v37 = vadd.f32 1.0, %v1222_v35  ;;  %v373_v54 = vmul.f32 -0.5, %v1222_v35  ;;  %v347_v2 = vadd.f32 1.0, %v346_v43  ;;  %v365_v7 = vadd.f32 1.0, %v364_v47 }
 0x125   :  { %v379_v39 = vadd.f32 1.0, %v881_v36  ;;  %v382_v45 = vmul.f32 -0.5, %v881_v36  ;;  %v385_v6 = vand.u32 2147483647, %v881_v36  ;;  %v329_v8 = vadd.f32 1.0, %v328_v48 }
 0x126   :  { %v883_v40 = vpop.eup %882  ;;  %890 = vlog2.f32 %v370_v37  ;;  %v374_v11 = vadd.f32 1.0, %v373_v54  ;;  %v376_v16 = vand.u32 2147483647, %v1222_v35  ;;  %vm1244_vm1 = vcmp.lt.f32.partialorder %v367_v0, 0.0004427343 }
 0x127   :  { %v388_v42 = vadd.f32 1.0, %v883_v40  ;;  %892 = vlog2.f32 %v379_v39  ;;  %v391_v51 = vmul.f32 -0.5, %v883_v40  ;;  %v383_v5 = vadd.f32 1.0, %v382_v45 }
 0x128   :  { %894 = vlog2.f32 %v343_v38  ;;  %v394_v15 = vand.u32 2147483647, %v883_v40  ;;  %v348_v23 = vmul.f32 %v1217_v32, %v347_v2  ;;  %vm1249_vm2 = vcmp.lt.f32.partialorder %v385_v6, 0.0004427343 }
 0x129   :  { %896 = vlog2.f32 %v388_v42  ;;  %v392_v10 = vadd.f32 1.0, %v391_v51  ;;  %v384_v25 = vmul.f32 %v881_v36, %v383_v5  ;;  %v366_v31 = vmul.f32 %v1214_v30, %v365_v7 }
 0x12a   :  { %898 = vlog2.f32 %v325_v41  ;;  %v885_v55 = vpop.eup %884  ;;  %v375_v39 = vmul.f32 %v1222_v35, %v374_v11  ;;  %vm395_vm3 = vcmp.lt.f32.partialorder %v394_v15, 0.0004427343  ;;  %vm377_vm4 = vcmp.lt.f32.partialorder %v376_v16, 0.0004427343 }
 0x12b   :  { %v393_v38 = vmul.f32 %v883_v40, %v392_v10  ;;  %v357_v45 = vmul.f32 %v1211_v28, %v356_v17  ;;  %v336_v47 = vmul.f32 0.6931472, %v885_v55  ;;  %vm1260_vm5 = vcmp.lt.f32.partialorder %v358_v12, 0.0004427343 }
 0x12c   :  { %vm1266_vm6 = vcmp.lt.f32.partialorder %v349_v13, 0.0004427343  ;;  %v339_v28 = vmul.f32 %v1209_v27, %v338_v18  ;;  %vm332_vm8 = vcmp.lt.f32.partialorder %v331_v60, 0.0004427343  ;;  %v286_v2 = vmax.f32 %v1187_v53, 0.0  ;;  %v407_v53 = vld [vmem:[%s1407_s3 + $0x10] sm:$0xff] }
 0x12e   :  { %v887_v61 = vpop.eup %886  ;;  %v342_v0 = vsel %vm341_vm7, %v339_v28, %v336_v47 }
 0x12f   :  { %v354_v41 = vmul.f32 0.6931472, %v887_v61  ;;  %v330_v61 = vmul.f32 %v1220_v34, %v329_v8  ;;  %v398_v34 = vadd.f32 %v342_v0, %v286_v2 }
 0x130   :  { %v889_v4 = vpop.eup %888 }
 0x131   :  { %v363_v29 = vmul.f32 0.6931472, %v889_v4  ;;  %v360_v54 = vsel %vm1260_vm5, %v357_v45, %v354_v41  ;;  %v285_v4 = vmax.f32 %v1185_v52, 0.0  ;;  %v406_v52 = vld [vmem:[%s1407_s3 + $0x8] sm:$0xff] }
 0x132   :  { %v400_v27 = vadd.f32 %v360_v54, %v288_v44  ;;  %v426_v44 = vpop.permute.xlu1 %425 }
 0x133   :  { %v891_v9 = vpop.eup %890  ;;  %v369_v30 = vsel %vm1244_vm1, %v366_v31, %v363_v29 }
 0x134   :  { %v893_v14 = vpop.eup %892  ;;  %v372_v21 = vmul.f32 0.6931472, %v891_v9 }
 0x135   :  { %v895_v19 = vpop.eup %894  ;;  %v381_v20 = vmul.f32 0.6931472, %v893_v14 }
 0x136   :  { %v897_v24 = vpop.eup %896  ;;  %v345_v32 = vmul.f32 0.6931472, %v895_v19  ;;  %v378_v43 = vsel %vm377_vm4, %v375_v39, %v372_v21  ;;  %v416_v5 = vpop.permute.xlu1 %415 }
 0x137   :  { %v899_v33 = vpop.eup %898  ;;  %v390_v37 = vmul.f32 0.6931472, %v897_v24  ;;  %v387_v42 = vsel %vm1249_vm2, %v384_v25, %v381_v20  ;;  %v402_v55 = vadd.f32 %v378_v43, %v290_v50 }
 0x138   :  { %v327_v35 = vmul.f32 0.6931472, %v899_v33  ;;  %v403_v51 = vadd.f32 %v387_v42, %v291_v57  ;;  %v351_v59 = vsel %vm1266_vm6, %v348_v23, %v345_v32  ;;  %v401_v57 = vadd.f32 %v369_v30, %v289_v49  ;;  %v431_v49 = vpop.permute.xlu0 %430 }
 0x139   :  { %v396_v36 = vsel %vm395_vm3, %v393_v38, %v390_v37 }
 0x13a   :  { %v404_v48 = vadd.f32 %v396_v36, %v292_v63  ;;  %v287_v63 = vmax.f32 %v1190_v56, 0.0  ;;  %v333_v50 = vsel %vm332_vm8, %v330_v61, %v327_v35 }
 0x13b   :  { %v397_v56 = vadd.f32 %v333_v50, %v285_v4 }
 0x13c   :  { %470 = vmatprep.subr.mxu1 %v404_v48  ;;  %v399_v3 = vadd.f32 %v351_v59, %v287_v63  ;;  %v421_v9 = vpop.permute.xlu0 %420 }
 0x13d   :  { %471 = vmatpush1.msra.mxu1 %v403_v51 }
 0x13e   :  { %472 = vmatprep.subr.mxu1 %v402_v55 }
 0x13f   :  { %473 = vmatpush1.msra.mxu1 %v401_v57 }
 0x140   :  { %474 = vmatprep.subr.mxu1 %v400_v27 }
 0x141   :  { %475 = vmatpush1.msra.mxu1 %v399_v3 }
 0x142   :  { %476 = vmatprep.subr.mxu1 %v398_v34 }
 0x143   :  { %477 = vmatpush1.msra.mxu1 %v397_v56 }
 0x144   :  { %816 = vmatmul.mubr.msk.f32.vlgmr.msra.gmra.mxu1 %vm433_vm9, %v405_v1 }
 0x145   :  { %516 = vmatprep.mubr.f32.mxu1 %v963_v46 }
 0x148   :  { %817 = vmatmul.mubr.msk.f32.gmra.mxu1 %vm433_vm9, %v406_v52 }
 0x149   :  { %522 = vmatprep.mubr.f32.mxu1 %v963_v46 }
 0x14c   :  { %818 = vmatmul.mubr.msk.f32.gmra.mxu1 %vm433_vm9, %v407_v53 }
 0x14d   :  { %528 = vmatprep.mubr.f32.mxu1 %v963_v46 }
 0x150   :  { %819 = vmatmul.mubr.msk.f32.gmra.mxu1 %vm433_vm9, %v408_v62 }
 0x151   :  { %729 = vmatprep.mubr.f32.mxu1 %v963_v46 }
 0x204   :  { %v512_v60 = vpop.f32.mrf.mxu1 }
 0x205   :  { %v1301_v7 = vadd.f32 %v512_v60, %v416_v5 }
 0x206   :  { %v514_v6 = vpop.f32.mrf.mxu1 }
 0x207   :  { %v1303_v8 = vadd.f32 %v514_v6, %v416_v5  ;;  %v543_v14 = vand.u32 2147483647, %v1301_v7 }
 0x208   :  { %v518_v10 = vpop.f32.mrf.mxu1 }
 0x209   :  { %v544_v11 = vand.u32 2147483647, %v1303_v8  ;;  %v1306_v12 = vadd.f32 %v518_v10, %v421_v9  ;;  %v551_v23 = vsub.f32 0.0, %v543_v14 }
 0x20a   :  { %v520_v13 = vpop.f32.mrf.mxu1 }
 0x20b   :  { %v552_v15 = vsub.f32 0.0, %v544_v11  ;;  %v545_v46 = vand.u32 2147483647, %v1306_v12  ;;  %v1310_v16 = vadd.f32 %v520_v13, %v421_v9  ;;  %v559_v42 = vmul.f32 1.442695, %v551_v23 }
 0x20c   :  { %v524_v17 = vpop.f32.mrf.mxu1 }
 0x20d   :  { %v561_v18 = vmul.f32 1.442695, %v552_v15  ;;  %v1312_v19 = vadd.f32 %v524_v17, %v426_v44  ;;  %v553_v20 = vsub.f32 0.0, %v545_v46  ;;  %v546_v21 = vand.u32 2147483647, %v1310_v16 }
 0x20e   :  { %v526_v22 = vpop.f32.mrf.mxu1  ;;  %v538_v53 = vmax.f32 %v1310_v16, 0.0 }
 0x20f   :  { %v547_v24 = vand.u32 2147483647, %v1312_v19  ;;  %v554_v25 = vsub.f32 0.0, %v546_v21  ;;  %v1316_v26 = vadd.f32 %v526_v22, %v426_v44  ;;  %900 = vpow2.f32 %v561_v18 }
 0x210   :  { %v530_v29 = vpop.f32.mrf.mxu1  ;;  %v563_v37 = vmul.f32 1.442695, %v553_v20 }
 0x211   :  { %v555_v31 = vsub.f32 0.0, %v547_v24  ;;  %v1318_v33 = vadd.f32 %v530_v29, %v431_v49  ;;  %v565_v38 = vmul.f32 1.442695, %v554_v25  ;;  %v548_v39 = vand.u32 2147483647, %v1316_v26 }
 0x212   :  { %v532_v41 = vpop.f32.mrf.mxu1  ;;  %v540_v60 = vmax.f32 %v1316_v26, 0.0 }
 0x213   :  { %v567_v32 = vmul.f32 1.442695, %v555_v31  ;;  %v549_v36 = vand.u32 2147483647, %v1318_v33  ;;  %v1322_v43 = vadd.f32 %v532_v41, %v431_v49  ;;  %902 = vpow2.f32 %v565_v38 }
 0x214   :  { %v556_v45 = vsub.f32 0.0, %v548_v39  ;;  %v539_v49 = vmax.f32 %v1312_v19, 0.0  ;;  %v541_v10 = vmax.f32 %v1318_v33, 0.0 }
 0x215   :  { %904 = vpow2.f32 %v567_v32  ;;  %v557_v47 = vsub.f32 0.0, %v549_v36  ;;  %v550_v48 = vand.u32 2147483647, %v1322_v43  ;;  %v542_v11 = vmax.f32 %v1322_v43, 0.0 }
 0x216   :  { %906 = vpow2.f32 %v563_v37  ;;  %v569_v30 = vmul.f32 1.442695, %v556_v45 }
 0x217   :  { %908 = vpow2.f32 %v559_v42  ;;  %v571_v40 = vmul.f32 1.442695, %v557_v47  ;;  %v558_v35 = vsub.f32 0.0, %v550_v48 }
 0x218   :  { %910 = vpow2.f32 %v569_v30 }
 0x219   :  { %912 = vpow2.f32 %v571_v40  ;;  %v573_v51 = vmul.f32 1.442695, %v558_v35 }
 0x21b   :  { %914 = vpow2.f32 %v573_v51 }
 0x21c   :  { %v1325_v54 = vpop.eup %900 }
 0x21d   :  { %v584_v28 = vadd.f32 1.0, %v1325_v54  ;;  %v587_v14 = vmul.f32 -0.5, %v1325_v54  ;;  %v590_v25 = vand.u32 2147483647, %v1325_v54 }
 0x21f   :  { %916 = vlog2.f32 %v584_v28  ;;  %v588_v32 = vadd.f32 1.0, %v587_v14  ;;  %vm591_vm0 = vcmp.lt.f32.partialorder %v590_v25, 0.0004427343 }
 0x220   :  { %v1327_v58 = vpop.eup %902 }
 0x221   :  { %v602_v59 = vadd.f32 1.0, %v1327_v58  ;;  %v605_v13 = vmul.f32 -0.5, %v1327_v58  ;;  %v608_v37 = vand.u32 2147483647, %v1327_v58 }
 0x222   :  { %v905_v55 = vpop.eup %904 }
 0x223   :  { %v1331_v61 = vpop.eup %906  ;;  %v611_v63 = vadd.f32 1.0, %v905_v55  ;;  %918 = vlog2.f32 %v602_v59  ;;  %v614_v62 = vmul.f32 -0.5, %v905_v55  ;;  %v617_v20 = vand.u32 2147483647, %v905_v55 }
 0x224   :  { %v1333_v57 = vpop.eup %908  ;;  %v593_v27 = vadd.f32 1.0, %v1331_v61  ;;  %v596_v52 = vmul.f32 -0.5, %v1331_v61  ;;  %v599_v29 = vand.u32 2147483647, %v1331_v61  ;;  %v606_v42 = vadd.f32 1.0, %v605_v13 }
 0x225   :  { %v1335_v0 = vpop.eup %910  ;;  %920 = vlog2.f32 %v611_v63  ;;  %v575_v34 = vadd.f32 1.0, %v1333_v57  ;;  %v578_v1 = vmul.f32 -0.5, %v1333_v57  ;;  %v581_v17 = vand.u32 2147483647, %v1333_v57 }
 0x226   :  { %v913_v2 = vpop.eup %912  ;;  %v620_v50 = vadd.f32 1.0, %v1335_v0  ;;  %v623_v6 = vmul.f32 -0.5, %v1335_v0  ;;  %v597_v18 = vadd.f32 1.0, %v596_v52  ;;  %v615_v22 = vadd.f32 1.0, %v614_v62 }
 0x227   :  { %v629_v4 = vadd.f32 1.0, %v913_v2  ;;  %v632_v44 = vmul.f32 -0.5, %v913_v2  ;;  %v579_v46 = vadd.f32 1.0, %v578_v1  ;;  %v635_v24 = vand.u32 2147483647, %v913_v2 }
 0x228   :  { %v915_v3 = vpop.eup %914  ;;  %922 = vlog2.f32 %v620_v50  ;;  %v624_v33 = vadd.f32 1.0, %v623_v6  ;;  %v626_v41 = vand.u32 2147483647, %v1335_v0  ;;  %v598_v43 = vmul.f32 %v1331_v61, %v597_v18 }
 0x229   :  { %924 = vlog2.f32 %v629_v4  ;;  %v638_v56 = vadd.f32 1.0, %v915_v3  ;;  %v641_v5 = vmul.f32 -0.5, %v915_v3  ;;  %v633_v23 = vadd.f32 1.0, %v632_v44 }
 0x22a   :  { %926 = vlog2.f32 %v593_v27  ;;  %v644_v39 = vand.u32 2147483647, %v915_v3  ;;  %vm1356_vm10 = vcmp.lt.f32.partialorder %v617_v20, 0.0004427343  ;;  %v616_v35 = vmul.f32 %v905_v55, %v615_v22 }
 0x22b   :  { %928 = vlog2.f32 %v638_v56  ;;  %v642_v31 = vadd.f32 1.0, %v641_v5  ;;  %v634_v51 = vmul.f32 %v913_v2, %v633_v23  ;;  %vm1360_vm11 = vcmp.lt.f32.partialorder %v635_v24, 0.0004427343 }
 0x22c   :  { %930 = vlog2.f32 %v575_v34  ;;  %v917_v9 = vpop.eup %916  ;;  %v625_v50 = vmul.f32 %v1335_v0, %v624_v33  ;;  %vm645_vm12 = vcmp.lt.f32.partialorder %v644_v39, 0.0004427343  ;;  %vm1367_vm13 = vcmp.lt.f32.partialorder %v626_v41, 0.0004427343 }
 0x22d   :  { %v643_v27 = vmul.f32 %v915_v3, %v642_v31  ;;  %v607_v1 = vmul.f32 %v1327_v58, %v606_v42  ;;  %v586_v52 = vmul.f32 0.6931472, %v917_v9  ;;  %vm1376_vm14 = vcmp.lt.f32.partialorder %v608_v37, 0.0004427343 }
 0x22e   :  { %vm1380_vm15 = vcmp.lt.f32.partialorder %v599_v29, 0.0004427343  ;;  %v589_v58 = vmul.f32 %v1325_v54, %v588_v32  ;;  %v580_v9 = vmul.f32 %v1333_v57, %v579_v46  ;;  %vm582_vm1 = vcmp.lt.f32.partialorder %v581_v17, 0.0004427343 }
 0x22f   :  { %v535_v57 = vmax.f32 %v1301_v7, 0.0  ;;  %v756_v33 = vlaneseq }
 0x230   :  { %v919_v15 = vpop.eup %918 }
 0x231   :  { %v604_v61 = vmul.f32 0.6931472, %v919_v15  ;;  %v537_v15 = vmax.f32 %v1306_v12, 0.0  ;;  %v655_v12 = vld [vmem:[%s1409_s5] sm:$0xf]  ;;  %s964_s5 = smov [#allocation2]  }
 0x232   :  { %v921_v21 = vpop.eup %920  ;;  %s772_s22 = sshll.u32 %s964_s5, 4  ;;  %s773_s22 = int_to_ptr.vmem [resolvable:$true] %s772_s22 }
 0x233   :  { %v613_v40 = vmul.f32 0.6931472, %v921_v21  ;;  %v610_v13 = vsel %vm1376_vm14, %v607_v1, %v604_v61  ;;  %v536_v21 = vmax.f32 %v1303_v8, 0.0  ;;  %v660_v8 = vpop.permute.xlu0 %659  ;;  %s940_s23 = scalar_lea.vmem %s773_s22, 128  ;;  %p945_p1 = scmp.lt.s32.totalorder %s773_s22, %s773_s22 }
 0x234   :  { %v650_v54 = vadd.f32 %v610_v13, %v538_v53  ;;  %p941_p0 = scmp.ne.s32.totalorder %s773_s22, %s940_s23  ;;  %p946_p2 = scmp.lt.s32.totalorder %s940_s23, %s940_s23 }
 0x235   :  { %v923_v26 = vpop.eup %922  ;;  %v619_v0 = vsel %vm1356_vm10, %v616_v35, %v613_v40 }
 0x236   :  { %v925_v38 = vpop.eup %924  ;;  %v622_v48 = vmul.f32 0.6931472, %v923_v26  ;;  %v651_v18 = vadd.f32 %v619_v0, %v539_v49  ;;  %p947_p3 = por %p946_p2, %p945_p1 }
 0x237   :  { %v927_v36 = vpop.eup %926  ;;  %v631_v47 = vmul.f32 0.6931472, %v925_v38  ;;  %v757_v38 = vshrl.u32 %v756_v33, 7 }
 0x238   :  { %v929_v30 = vpop.eup %928  ;;  %v595_v4 = vmul.f32 0.6931472, %v927_v36  ;;  %v628_v2 = vsel %vm1367_vm13, %v625_v50, %v622_v48  ;;  %p948_p4 = pnand %p947_p3, %p941_p0 }
 0x239   :  { %v931_v59 = vpop.eup %930  ;;  %v640_v63 = vmul.f32 0.6931472, %v929_v30  ;;  %v637_v34 = vsel %vm1360_vm11, %v634_v51, %v631_v47  ;;  %vm758_vm2 = vcmp.lt.s32.totalorder %v757_v38, 2 }
 0x23a   :  { %v577_v3 = vmul.f32 0.6931472, %v931_v59  ;;  %v653_v6 = vadd.f32 %v637_v34, %v541_v10  ;;  %v601_v14 = vsel %vm1380_vm15, %v598_v43, %v595_v4  ;;  %v592_v10 = vsel %vm591_vm0, %v589_v58, %v586_v52 }
 0x23b   :  { %v646_v55 = vsel %vm645_vm12, %v643_v27, %v640_v63  ;;  %v649_v46 = vadd.f32 %v601_v14, %v537_v15 }
 0x23c   :  { %v654_v62 = vadd.f32 %v646_v55, %v542_v11  ;;  %v652_v11 = vadd.f32 %v628_v2, %v540_v60  ;;  %v583_v20 = vsel %vm582_vm1, %v580_v9, %v577_v3  ;;  %v648_v60 = vadd.f32 %v592_v10, %v536_v21 }
 0x23d   :  { %v647_v17 = vadd.f32 %v583_v20, %v535_v57 }
 0x23e   :  { %689 = vmatprep.subr.mxu1 %v654_v62 }
 0x23f   :  { %690 = vmatpush1.msra.mxu1 %v653_v6 }
 0x240   :  { %691 = vmatprep.subr.mxu1 %v652_v11 }
 0x241   :  { %692 = vmatpush1.msra.mxu1 %v651_v18 }
 0x242   :  { %693 = vmatprep.subr.mxu1 %v650_v54 }
 0x243   :  { %694 = vmatpush1.msra.mxu1 %v649_v46 }
 0x244   :  { %695 = vmatprep.subr.mxu1 %v648_v60 }
 0x245   :  { %696 = vmatpush1.msra.mxu1 %v647_v17 }
 0x246   :  { %820 = vmatmul.mubr.msk.f32.vlgmr.msra.gmra.mxu1 %vm433_vm9, %v655_v12 }
 0x306   :  { %v731_v19 = vpop.f32.mrf.mxu1 }
 0x307   :  { %v732_v16 = vadd.f32 %v731_v19, %v660_v8 }
 0x308   :  { %v733_v53 = vpop.f32.mrf.mxu1 }
 0x309   :  { %v736_v49 = vsub.f32 0.0, %v732_v16  ;;  %v734_v7 = vadd.f32 %v733_v53, %v660_v8  ;;  %v752_v39 = vmax.f32 %v732_v16, 0.0 }
 0x30b   :  { %v738_v22 = vmul.f32 1.442695, %v736_v49  ;;  %v737_v23 = vsub.f32 0.0, %v734_v7  ;;  %v753_v41 = vmax.f32 %v734_v7, 0.0  ;;  %v754_v45 = vadd.f32 0.1, %v752_v39 }
 0x30d   :  { %932 = vpow2.f32 %v738_v22  ;;  %v740_v24 = vmul.f32 1.442695, %v737_v23  ;;  %v755_v47 = vadd.f32 0.1, %v753_v41 }
 0x30f   :  { %934 = vpow2.f32 %v740_v24 }
 0x31a   :  { %v933_v25 = vpop.eup %932 }
 0x31b   :  { %v742_v26 = vadd.f32 1.0, %v933_v25 }
 0x31c   :  { %v935_v29 = vpop.eup %934 }
 0x31d   :  { %936 = vrcp.f32 %v742_v26  ;;  %v743_v31 = vadd.f32 1.0, %v935_v29 }
 0x31f   :  { %938 = vrcp.f32 %v743_v31 }
 0x32a   :  { %v937_v37 = vpop.eup %936 }
 0x32b   :  { %v748_v42 = vmul.f32 6.2831855, %v937_v37 }
 0x32c   :  { %v939_v32 = vpop.eup %938 }
 0x32d   :  { %v749_v36 = vmul.f32 6.2831855, %v939_v32  ;;  %v821_v43 = vadd.f32 -3.1415927, %v748_v42 }
 0x32f   :  { %v822_v48 = vadd.f32 -3.1415927, %v749_v36  ;;  %v759_v30 = vsel %vm758_vm2, %v821_v43, %v754_v45 }
 0x331   :  { %v760_v40 = vsel %vm758_vm2, %v822_v48, %v755_v47 }
 0x332   :  { %v763_v35 = vcombine.low %v759_v30, %v760_v40 }
 0x334   :  { %765 = vst [vmem:[#allocation2] sm:$0xff] %v763_v35 }
 0x335   :  { %951 = shalt.err (!%p948_p4)
}
 0x336   :  { %775 = dma.vmem_to_hbm [thread:$0]  %s773_s22, 128, %s1411_s7, [#allocation3]  }
 0x337   :  { %960 = dma.done.wait [#allocation3], 128  }
 0x338   :  { %961 = vsyncadd [#allocation3], 4294967168 }
 0x339   :  { %779 = vsyncpa [#allocation3], 1 }

</bundles_post_ra>
